<compile_context>
chip_gen: v6e
topology: v6e:2x2x1
jax: 0.10.0
libtpu: 0.0.40
codegen_flags: <defaults>
</compile_context>

<pallas_src>
import jax
import jax.numpy as jnp
from jax.experimental import pallas as pl
from jax.experimental.pallas import tpu as pltpu


def _round_up(n, m):
    return ((n + m - 1) // m) * m


def _normalizer_kernel(x_ref, p_ref, o_ref):
    # p_ref row 0 = mean, row 1 = 1/std (exact, precomputed in the wrapper).
    x = x_ref[...]                      # (tile_rows, W)
    mean = p_ref[0:1, :]                # (1, W) -> broadcasts over sublanes
    inv_std = p_ref[1:2, :]             # (1, W)
    o_ref[...] = (x - mean) * inv_std   # pure VPU: no per-element f32 divide


def normalizer_forward(x, mean, std, *, target_block_bytes=2 * 1024 * 1024):
    """Apply (x - mean) / std with a Pallas TPU kernel.

    x:    (B, in_dim) float32
    mean: (in_dim,)   float32
    std:  (in_dim,)   float32
    """
    B, D = x.shape
    assert mean.shape == (D,) and std.shape == (D,)
    dtype = x.dtype

    # Exact reciprocal computed once on the (D,) vector (keeps torch-level
    # accuracy; std == 0 still yields inf exactly like torch's divide).
    mean_v = mean.astype(dtype)
    inv_v = (1.0 / std).astype(dtype)

    if D < 128 and 128 % D == 0:
        # --- lane-dense repack: 128//D consecutive rows per 128-lane row ---
        group = 128 // D
        Bp = _round_up(B, group)
        x_work = jnp.pad(x, ((0, Bp - B), (0, 0))) if Bp != B else x
        W = 128
        R = (Bp * D) // 128
        x_work = x_work.reshape(R, W)
        mean_w = jnp.tile(mean_v, group)          # (128,)
        inv_w = jnp.tile(inv_v, group)            # (128,)
        layout = ("repacked", Bp)
    elif D % 128 != 0:
        # --- pad feature dim up to a multiple of 128 lanes ---
        Dp = _round_up(D, 128)
        x_work = jnp.pad(x, ((0, 0), (0, Dp - D)))
        mean_w = jnp.pad(mean_v, (0, Dp - D))
        inv_w = jnp.pad(inv_v, (0, Dp - D), constant_values=1.0)  # avoid inf in pad lanes
        W, R = Dp, B
        layout = ("padded_d", None)
    else:
        # D already a multiple of 128: use as-is.
        # TODO(synk): no tiling over the feature axis; assumes a row fits VMEM.
        x_work, mean_w, inv_w = x, mean_v, inv_v
        W, R = D, B
        layout = ("plain", None)

    # Fused resident parameter block: row 0 = mean, row 1 = 1/std.
    params = jnp.stack([mean_w, inv_w], axis=0)   # (2, W)

    # Row tiling: ~target_block_bytes per x block, multiple of 8 sublanes.
    bytes_per_row = W * x_work.dtype.itemsize
    tile_rows = max(8, target_block_bytes // max(1, bytes_per_row))
    tile_rows = (tile_rows // 8) * 8
    R_pad = _round_up(R, 8)
    tile_rows = min(tile_rows, R_pad)
    R_pad = _round_up(R, tile_rows)
    if R_pad != R:
        x_work = jnp.pad(x_work, ((0, R_pad - R), (0, 0)))
    grid = (R_pad // tile_rows,)

    out = pl.pallas_call(
        _normalizer_kernel,
        out_shape=jax.ShapeDtypeStruct((R_pad, W), dtype),
        grid_spec=pl.GridSpec(
            grid=grid,
            in_specs=[
                pl.BlockSpec((tile_rows, W), lambda i: (i, 0)),  # x tile (pipelined)
                pl.BlockSpec((2, W), lambda i: (0, 0)),          # mean+inv_std (resident)
            ],
            out_specs=pl.BlockSpec((tile_rows, W), lambda i: (i, 0)),
        ),
        compiler_params=pltpu.CompilerParams(
            dimension_semantics=("parallel",),   # batch-row axis shards across TCs
            vmem_limit_bytes=32 * 1024 * 1024,   # safe on v5e/v6e (128 MiB) and v7x (64 MiB)
        ),
    )(x_work, params)

    # Undo the layout transform / padding.
    kind, extra = layout
    if kind == "repacked":
        Bp = extra
        return out[:R].reshape(Bp, D)[:B, :]
    elif kind == "padded_d":
        return out[:B, :D]
    else:
        return out[:B, :]


if __name__ == "__main__":
    key = jax.random.PRNGKey(0)

    def check(batch, in_dim, k):
        k_x, k_m, k_s = jax.random.split(k, 3)
        x = jax.random.normal(k_x, (batch, in_dim), dtype=jnp.float32)
        mean = 0.1 * jax.random.normal(k_m, (in_dim,), dtype=jnp.float32)
        std = 1.0 + 0.05 * jax.random.uniform(k_s, (in_dim,), dtype=jnp.float32)

        out = normalizer_forward(x, mean, std)
        out = jax.block_until_ready(out)

        ref = (x - mean[None, :]) / std[None, :]
        assert out.shape == (batch, in_dim)
        assert jnp.allclose(out, ref, atol=1e-5, rtol=1e-5), (batch, in_dim)

    # Primary shape from the RL use case: small state normalizer.
    k0, k1, k2 = jax.random.split(key, 3)
    check(batch=8, in_dim=32, k=k0)          # lane-dense repack path (D | 128)
    check(batch=10, in_dim=32, k=k1)         # repack path with row padding
    check(batch=37, in_dim=17, k=k2)         # feature-pad path, non-divisible batch

    print("KERNEL_OK")
</pallas_src>

<mosaic_0001>
module attributes {stable_mosaic.version = 11 : i64} {
  func.func @_normalizer_kernel(%arg0: i32, %arg1: memref<8x128xf32, #tpu.memory_space<vmem>>, %arg2: memref<2x128xf32, #tpu.memory_space<vmem>>, %arg3: memref<8x128xf32, #tpu.memory_space<vmem>>) attributes {dimension_semantics = [#tpu.dimension_semantics<parallel>], iteration_bounds = array<i64: 1>, scalar_prefetch = 0 : i64, scratch_operands = 0 : i64, tpu.core_type = #tpu.core_type<tc>, window_params = [{transform_indices = @transform_0, window_bounds = array<i64: 8, 128>}, {pipeline_mode = #tpu.pipeline_mode<synchronous>, transform_indices = @transform_1, window_bounds = array<i64: 2, 128>}, {transform_indices = @transform_2, window_bounds = array<i64: 8, 128>}]} {
    %c0 = arith.constant 0 : index
    %c0_0 = arith.constant 0 : index
    %0 = vector.load %arg1[%c0, %c0_0] : memref<8x128xf32, #tpu.memory_space<vmem>>, vector<8x128xf32>
    %c0_1 = arith.constant 0 : index
    %c0_2 = arith.constant 0 : index
    %1 = vector.load %arg2[%c0_1, %c0_2] : memref<2x128xf32, #tpu.memory_space<vmem>>, vector<1x128xf32>
    %c1 = arith.constant 1 : index
    %c0_3 = arith.constant 0 : index
    %2 = vector.load %arg2[%c1, %c0_3] : memref<2x128xf32, #tpu.memory_space<vmem>>, vector<1x128xf32>
    %3 = vector.broadcast %1 : vector<1x128xf32> to vector<8x128xf32>
    %4 = arith.subf %0, %3 : vector<8x128xf32>
    %5 = vector.broadcast %2 : vector<1x128xf32> to vector<8x128xf32>
    %6 = arith.mulf %4, %5 : vector<8x128xf32>
    %c0_4 = arith.constant 0 : index
    %c0_5 = arith.constant 0 : index
    %7 = vector.load %arg3[%c0_4, %c0_5] : memref<8x128xf32, #tpu.memory_space<vmem>>, vector<8x128xf32>
    tpu.vector_store %arg3[%c0_4, %c0_5], %6 {strides = array<i32>} : memref<8x128xf32, #tpu.memory_space<vmem>>, vector<8x128xf32>,
    return
  }
  func.func @transform_0(%arg0: i32) -> (i32, i32) {
    %c0_i32 = arith.constant 0 : i32
    %c0_i32_0 = arith.constant 0 : i32
    return %arg0, %c0_i32 : i32, i32
  }
  func.func @transform_1(%arg0: i32) -> (i32, i32) {
    %c0_i32 = arith.constant 0 : i32
    %c0_i32_0 = arith.constant 0 : i32
    %c0_i32_1 = arith.constant 0 : i32
    return %c0_i32, %c0_i32_0 : i32, i32
  }
  func.func @transform_2(%arg0: i32) -> (i32, i32) {
    %c0_i32 = arith.constant 0 : i32
    %c0_i32_0 = arith.constant 0 : i32
    return %arg0, %c0_i32 : i32, i32
  }
}

</mosaic_0001>

<bundles_post_ra>
// kernel: tpu_custom_call.1
= control target key start
LH: loop header
LB: loop body
LE: loop exit
PB: predicated region body
PF: predicated region fallthrough
CT: control target
= control target key end

     0   :  { %7 = vsyncpa [#allocation3], 0  ;;  %s164_s0 = inlined_call_operand.hbm [shape: f32[8,128], index: 0, kind: input, shape index: {}]   ;;  %s165_s1 = inlined_call_operand.hbm [shape: f32[2,128], index: 1, kind: input, shape index: {}]   ;;  %s166_s2 = inlined_call_operand.hbm [shape: f32[8,128], index: 2, kind: output, shape index: {}]  }
   0x1   :  { %8 = vsyncpa [#allocation6], 0 }
   0x2   :  { %9 = vsyncpa [#allocation4], 0  ;;  %s137_s9 = smov [#allocation2]   ;;  %s138_s11 = smov [#allocation5]  }
   0x3   :  { %s16_s10 = sshll.u32 %s137_s9, 4  ;;  %s26_s12 = sshll.u32 %s138_s11, 4  ;;  %s17_s10 = int_to_ptr.vmem [resolvable:$true] %s16_s10  ;;  %s27_s12 = int_to_ptr.vmem [resolvable:$true] %s26_s12 }
   0x4   :  { %s79_s13 = scalar_lea.vmem %s17_s10, 128  ;;  %p84_p1 = scmp.lt.s32.totalorder %s17_s10, %s17_s10 }
   0x5   :  { %p80_p0 = scmp.ne.s32.totalorder %s17_s10, %s79_s13  ;;  %p85_p2 = scmp.lt.s32.totalorder %s79_s13, %s79_s13 }
   0x7   :  { %p86_p3 = por %p85_p2, %p84_p1 }
   0x9   :  { %p87_p4 = pnand %p86_p3, %p80_p0 }
   0xb   :  { %90 = shalt.err (!%p87_p4)
}
   0xc   :  { %19 = dma.hbm_to_vmem [thread:$0]  %s164_s0, 128, %s17_s10, [#allocation3]  }
   0xd   :  { %s99_s16 = scalar_lea.vmem %s27_s12, 32  ;;  %p104_p6 = scmp.lt.s32.totalorder %s27_s12, %s27_s12 }
   0xe   :  { %p100_p5 = scmp.ne.s32.totalorder %s27_s12, %s99_s16  ;;  %p105_p7 = scmp.lt.s32.totalorder %s99_s16, %s99_s16 }
  0x10   :  { %p106_p8 = por %p105_p7, %p104_p6 }
  0x12   :  { %p107_p9 = pnand %p106_p8, %p100_p5 }
  0x14   :  { %110 = shalt.err (!%p107_p9)
}
  0x15   :  { %29 = dma.hbm_to_vmem [thread:$0]  %s165_s1, 32, %s27_s12, [#allocation6]  }
  0x16   :  { %131 = dma.done.wait [#allocation3], 128  }
  0x17   :  { %132 = vsyncadd [#allocation3], 4294967168 }
  0x18   :  { %133 = dma.done.wait [#allocation6], 32  }
  0x19   :  { %134 = vsyncadd [#allocation6], 4294967264  ;;  %v36_v0 = vld [vmem:[#allocation2] sm:$0xff]  ;;  %v66_v1 = vld [vmem:[#allocation5] ss:$0 sm:$0xff]  ;;  %s139_s19 = smov [#allocation7]  }
  0x1a   :  { %v67_v2 = vld [vmem:[#allocation5 + $0x1] ss:$0 sm:$0xff]  ;;  %s56_s0 = sshll.u32 %s139_s19, 4  ;;  %v43_v3 = vsub.f32 %v36_v0, %v66_v1  ;;  %s57_s0 = int_to_ptr.vmem [resolvable:$true] %s56_s0 }
  0x1b   :  { %s111_s20 = scalar_lea.vmem %s57_s0, 128  ;;  %p116_p11 = scmp.lt.s32.totalorder %s57_s0, %s57_s0 }
  0x1c   :  { %v48_v4 = vmul.f32 %v67_v2, %v43_v3  ;;  %p112_p10 = scmp.ne.s32.totalorder %s57_s0, %s111_s20  ;;  %p117_p12 = scmp.lt.s32.totalorder %s111_s20, %s111_s20 }
  0x1e   :  { %49 = vst [vmem:[#allocation7] sm:$0xff] %v48_v4  ;;  %p118_p13 = por %p117_p12, %p116_p11 }
  0x20   :  { %p119_p0 = pnand %p118_p13, %p112_p10 }
  0x22   :  { %122 = shalt.err (!%p119_p0)
}
  0x23   :  { %59 = dma.vmem_to_hbm [thread:$0]  %s57_s0, 128, %s166_s2, [#allocation4]  }
  0x24   :  { %135 = dma.done.wait [#allocation4], 128  }
  0x25   :  { %136 = vsyncadd [#allocation4], 4294967168 }
  0x26   :  { %63 = vsyncpa [#allocation3], 1 }
  0x27   :  { %64 = vsyncpa [#allocation6], 1 }
  0x28   :  { %65 = vsyncpa [#allocation4], 1 }

</bundles_post_ra>
